<compile_context>
chip_gen: v6e
topology: v6e:2x2x1
jax: 0.10.0
libtpu: 0.0.40
codegen_flags: <defaults>
</compile_context>

<pallas_src>
import math
from types import SimpleNamespace

import numpy as np
import jax
import jax.numpy as jnp
from jax.experimental import pallas as pl
from jax.experimental.pallas import tpu as pltpu

EPS = 1e-5
_VMEM = pl.BlockSpec(memory_space=pltpu.MemorySpace.VMEM)


# ------------------------------ fused kernel --------------------------------

def fused_kernel(x_ref, rw_ref, rb_ref, w_ref, b_ref, o_ref):
    # x_ref : [M, T]  lane-dense input rows (one (batch, channel) series per row)
    # rw_ref: [M, 1]  RevIN affine weight per row
    # rb_ref: [M, 1]  RevIN affine bias per row
    # w_ref : [T, P]  pre-folded U-Net + FITS matrix
    # b_ref : [1, P]  pre-folded bias
    # o_ref : [M, P]
    x = x_ref[...].astype(jnp.float32)

    # ---- RevIN 'norm' (per-row stats; T on lanes -> lane reductions) ----
    mean = jnp.mean(x, axis=1, keepdims=True)
    xc = x - mean
    var = jnp.mean(xc * xc, axis=1, keepdims=True)          # unbiased=False
    std = jnp.sqrt(var + EPS)
    rw = rw_ref[...]
    rb = rb_ref[...]
    xn = xc * (rw / std) + rb

    # ---- entire U-Net (down/up) + FITS chain: one MXU matmul ----
    y = jnp.dot(xn, w_ref[...], preferred_element_type=jnp.float32) + b_ref[...]

    # ---- RevIN 'denorm' ----
    y = (y - rb) / (rw + EPS * EPS)
    y = y * std + mean
    o_ref[...] = y.astype(o_ref.dtype)


# ------------------------------ model set-up --------------------------------

def _avgpool_matrix(L, k, s, p):
    """AvgPool1d (count_include_pad=True, the PyTorch default) as an (L, L_out) matrix."""
    L_out = (L + 2 * p - k) // s + 1
    P = np.zeros((L, L_out), dtype=np.float64)
    for j in range(L_out):
        for t in range(j * s - p, j * s - p + k):
            if 0 <= t < L:
                P[t, j] = 1.0 / k
    return P


def _linear_init(key, fan_in, fan_out):
    """torch.nn.Linear default init; returns float64 numpy, W already [in, out]."""
    kw, kb = jax.random.split(key)
    bound = 1.0 / math.sqrt(fan_in)
    w = jax.random.uniform(kw, (fan_in, fan_out), jnp.float32, -bound, bound)
    b = jax.random.uniform(kb, (fan_out,), jnp.float32, -bound, bound)
    return np.asarray(w, np.float64), np.asarray(b, np.float64)


def build_model(configs, key):
    assert not configs.individual, "only individual=False is implemented"
    C = configs.enc_in
    sn = configs.stage_num
    kk, ss, pp = (configs.stage_pool_kernel, configs.stage_pool_stride,
                  configs.stage_pool_padding)

    # Stage lengths (mirrors Model.__init__).
    len_in, len_out = configs.seq_len, configs.pred_len
    down_in, down_out = [len_in], [len_out]
    for _ in range(sn - 1):
        li = int((len_in + 2 * pp - kk) / ss + 1)
        lo = int((len_out + 2 * pp - kk) / ss + 1)
        down_in.append(li)
        down_out.append(lo)
        len_in, len_out = li, lo

    keys = jax.random.split(key, sn + (sn - 1) + 2)
    ki = 0

    # down blocks: block_model(individual=False) == nn.Linear(in_len, out_len)
    # (its LayerNorm / ReLU exist in __init__ but are never used in forward).
    down = []
    for i_len, o_len in zip(down_in, down_out):
        W, b = _linear_init(keys[ki], i_len, o_len); ki += 1
        down.append((W, b))

    # AvgPool1d matrices for stages 0..sn-2 (the last pool's output is discarded).
    pools = []
    L = configs.seq_len
    for _ in range(sn - 1):
        P = _avgpool_matrix(L, kk, ss, pp)
        pools.append(P)
        L = P.shape[1]

    # up blocks: Linear(skip_len + prev_len, out_len); the torch concat puts the
    # skip connection FIRST, so the weight is split accordingly.
    up = []
    for i in range(sn - 1):
        skip_len = down_out[sn - i - 2]
        prev_len = down_out[sn - i - 1]
        out_len = down_out[sn - i - 2]
        W, b = _linear_init(keys[ki], skip_len + prev_len, out_len); ki += 1
        up.append((W[:skip_len, :], W[skip_len:, :], b))

    # FITS: rfft -> complex Linear(F -> F) -> irfft on the pred_len-long series,
    # folded into ONE real (pred_len, pred_len) matrix + bias via the analytic
    # real-DFT analysis (Fr, Fi) and synthesis (Dr, Di) matrices.
    # TODO(synk): FITS class source was not provided; the canonical length-
    # preserving frequency-domain complex Linear (in = out = pred_len) is assumed.
    N = configs.pred_len
    F_ = N // 2 + 1
    wr, br = _linear_init(keys[ki], F_, F_); ki += 1
    wi, bi = _linear_init(keys[ki], F_, F_); ki += 1
    n = np.arange(N, dtype=np.float64)[:, None]
    k = np.arange(F_, dtype=np.float64)[None, :]
    ang = 2.0 * np.pi * n * k / N                    # [N, F]
    Fr = np.cos(ang)                                 # rfft real part:  Xr = x @ Fr
    Fi = -np.sin(ang)                                # rfft imag part:  Xi = x @ Fi
    scale = np.full((F_,), 2.0, dtype=np.float64)
    scale[0] = 1.0
    if N % 2 == 0:
        scale[-1] = 1.0
    Dr = (scale[:, None] / N) * np.cos(ang.T)        # irfft from real part  [F, N]
    Di = -(scale[:, None] / N) * np.sin(ang.T)       # irfft from imag part  [F, N]
    Mf = Fr @ (wr @ Dr + wi @ Di) + Fi @ (wr @ Di - wi @ Dr)
    bf = br @ Dr + bi @ Di

    # ---- Fold the entire linear chain xn -> y into one matrix + bias ----
    # Represent e_out[i] = xn @ A[i] + c[i].
    A, c = [], []
    Pacc = np.eye(configs.seq_len, dtype=np.float64)
    for i in range(sn):
        A.append(Pacc @ down[i][0])
        c.append(down[i][1].copy())
        if i < sn - 1:
            Pacc = Pacc @ pools[i]                   # pooled input feeds the next stage
    A_e, c_e = A[sn - 1], c[sn - 1]
    for i in range(sn - 1):                          # decoder: concat folded into split weights
        Wa, Wb, bu = up[i]
        A_s, c_s = A[sn - i - 2], c[sn - i - 2]
        A_e = A_s @ Wa + A_e @ Wb
        c_e = c_s @ Wa + c_e @ Wb + bu
    A_e = A_e @ Mf                                   # FITS
    c_e = c_e @ Mf + bf

    params = {
        "revin_w": jnp.ones((C,), jnp.float32),      # RevIN affine init (weight=1, bias=0)
        "revin_b": jnp.zeros((C,), jnp.float32),
        "w_total": jnp.asarray(A_e, jnp.float32),    # [seq_len, pred_len]
        "b_total": jnp.asarray(c_e, jnp.float32).reshape(1, N),
    }
    static = SimpleNamespace(pred_len=configs.pred_len)
    return params, static


# --------------------------------- forward ----------------------------------

def forward(params, static, x):
    B, T, C = x.shape
    M = B * C

    # Boundary layout transform only: [B, T, C] -> lane-dense [B*C, T].
    xp = jnp.transpose(x, (0, 2, 1)).reshape(M, T)
    rw = jnp.tile(params["revin_w"], B).reshape(M, 1)    # per-row (b, c) scalar
    rb = jnp.tile(params["revin_b"], B).reshape(M, 1)

    out_rows = pl.pallas_call(
        fused_kernel,
        out_shape=jax.ShapeDtypeStruct((M, static.pred_len), x.dtype),
        in_specs=[_VMEM] * 5,
        out_specs=_VMEM,
    )(xp, rw, rb, params["w_total"], params["b_total"])

    return jnp.transpose(out_rows.reshape(B, C, static.pred_len), (0, 2, 1))


# ----------------------------------- main ------------------------------------

if __name__ == "__main__":
    configs = SimpleNamespace(
        enc_in=4, seq_len=16, pred_len=16, individual=False,
        stage_num=2, stage_pool_kernel=3, stage_pool_stride=2,
        stage_pool_padding=1,
    )
    params, static = build_model(configs, jax.random.PRNGKey(42))

    x = jax.random.normal(jax.random.PRNGKey(0),
                          (2, configs.seq_len, configs.enc_in), jnp.float32)

    run = jax.jit(lambda p, xx: forward(p, static, xx))
    out = run(params, x)
    jax.block_until_ready(out)

    assert out.shape == (2, configs.pred_len, configs.enc_in), out.shape
    assert bool(jnp.all(jnp.isfinite(out)))
    print("KERNEL_OK")
</pallas_src>

<mosaic_0001>
module attributes {stable_mosaic.version = 11 : i64} {
  func.func @fused_kernel(%arg0: memref<8x16xf32, #tpu.memory_space<vmem>>, %arg1: memref<8x1xf32, #tpu.memory_space<vmem>>, %arg2: memref<8x1xf32, #tpu.memory_space<vmem>>, %arg3: memref<16x16xf32, #tpu.memory_space<vmem>>, %arg4: memref<1x16xf32, #tpu.memory_space<vmem>>, %arg5: memref<8x16xf32, #tpu.memory_space<vmem>>) attributes {dimension_semantics = [], scalar_prefetch = 0 : i64, scratch_operands = 0 : i64, tpu.core_type = #tpu.core_type<tc>} {
    %c0 = arith.constant 0 : index
    %c0_0 = arith.constant 0 : index
    %0 = vector.load %arg0[%c0, %c0_0] : memref<8x16xf32, #tpu.memory_space<vmem>>, vector<8x16xf32>
    %cst = arith.constant dense<0.000000e+00> : vector<8xf32>
    %1 = vector.multi_reduction <add>, %0, %cst [1] : vector<8x16xf32> to vector<8xf32>
    %2 = vector.shape_cast %1 : vector<8xf32> to vector<8x1xf32>
    %cst_1 = arith.constant 1.600000e+01 : f32
    %3 = vector.broadcast %cst_1 : f32 to vector<8x1xf32>
    %4 = arith.divf %2, %3 : vector<8x1xf32>
    %5 = vector.broadcast %4 : vector<8x1xf32> to vector<8x16xf32>
    %6 = arith.subf %0, %5 : vector<8x16xf32>
    %7 = arith.mulf %6, %6 : vector<8x16xf32>
    %cst_2 = arith.constant dense<0.000000e+00> : vector<8xf32>
    %8 = vector.multi_reduction <add>, %7, %cst_2 [1] : vector<8x16xf32> to vector<8xf32>
    %9 = vector.shape_cast %8 : vector<8xf32> to vector<8x1xf32>
    %cst_3 = arith.constant 1.600000e+01 : f32
    %10 = vector.broadcast %cst_3 : f32 to vector<8x1xf32>
    %11 = arith.divf %9, %10 : vector<8x1xf32>
    %cst_4 = arith.constant 9.99999974E-6 : f32
    %12 = vector.broadcast %cst_4 : f32 to vector<8x1xf32>
    %13 = arith.addf %11, %12 : vector<8x1xf32>
    %14 = math.sqrt %13 : vector<8x1xf32>
    %c0_5 = arith.constant 0 : index
    %c0_6 = arith.constant 0 : index
    %15 = vector.load %arg1[%c0_5, %c0_6] : memref<8x1xf32, #tpu.memory_space<vmem>>, vector<8x1xf32>
    %c0_7 = arith.constant 0 : index
    %c0_8 = arith.constant 0 : index
    %16 = vector.load %arg2[%c0_7, %c0_8] : memref<8x1xf32, #tpu.memory_space<vmem>>, vector<8x1xf32>
    %17 = arith.divf %15, %14 : vector<8x1xf32>
    %18 = vector.broadcast %17 : vector<8x1xf32> to vector<8x16xf32>
    %19 = arith.mulf %6, %18 : vector<8x16xf32>
    %20 = vector.broadcast %16 : vector<8x1xf32> to vector<8x16xf32>
    %21 = arith.addf %19, %20 : vector<8x16xf32>
    %c0_9 = arith.constant 0 : index
    %c0_10 = arith.constant 0 : index
    %22 = vector.load %arg3[%c0_9, %c0_10] : memref<16x16xf32, #tpu.memory_space<vmem>>, vector<16x16xf32>
    %cst_11 = arith.constant dense<0.000000e+00> : vector<8x16xf32>
    %23 = tpu.matmul %21, %22, %cst_11 {dimension_numbers = #tpu.dot_dimension_numbers<[1], [0], [0], [1], [0, 0, 1, 1], [], []>} : vector<8x16xf32>, vector<16x16xf32>, vector<8x16xf32> -> vector<8x16xf32>
    %c0_12 = arith.constant 0 : index
    %c0_13 = arith.constant 0 : index
    %24 = vector.load %arg4[%c0_12, %c0_13] : memref<1x16xf32, #tpu.memory_space<vmem>>, vector<1x16xf32>
    %25 = vector.broadcast %24 : vector<1x16xf32> to vector<8x16xf32>
    %26 = arith.addf %23, %25 : vector<8x16xf32>
    %27 = vector.broadcast %16 : vector<8x1xf32> to vector<8x16xf32>
    %28 = arith.subf %26, %27 : vector<8x16xf32>
    %cst_14 = arith.constant 1.000000e-10 : f32
    %29 = vector.broadcast %cst_14 : f32 to vector<8x1xf32>
    %30 = arith.addf %15, %29 : vector<8x1xf32>
    %31 = vector.broadcast %30 : vector<8x1xf32> to vector<8x16xf32>
    %32 = arith.divf %28, %31 : vector<8x16xf32>
    %33 = vector.broadcast %14 : vector<8x1xf32> to vector<8x16xf32>
    %34 = arith.mulf %32, %33 : vector<8x16xf32>
    %35 = vector.broadcast %4 : vector<8x1xf32> to vector<8x16xf32>
    %36 = arith.addf %34, %35 : vector<8x16xf32>
    %c0_15 = arith.constant 0 : index
    %c0_16 = arith.constant 0 : index
    %37 = vector.load %arg5[%c0_15, %c0_16] : memref<8x16xf32, #tpu.memory_space<vmem>>, vector<8x16xf32>
    tpu.vector_store %arg5[%c0_15, %c0_16], %36 {strides = array<i32>} : memref<8x16xf32, #tpu.memory_space<vmem>>, vector<8x16xf32>,
    return
  }
}

</mosaic_0001>

<bundles_post_ra>
// kernel: tile.0
= control target key start
LH: loop header
LB: loop body
LE: loop exit
PB: predicated region body
PF: predicated region fallthrough
CT: control target
= control target key end

     0   :  { %s35_s8 = smov 125   ;;  %vm8_vm0 = vcmask 7168   ;;  %s36_s11 = smov 126   ;;  %s62_s0 = inlined_call_operand.vmem [shape: f32[2,4], index: 0, kind: input, shape index: {}]   ;;  %s63_s1 = inlined_call_operand.vmem [shape: f32[8,1], index: 1, kind: output, shape index: {}]  }
   0x1   :  { %v5_v0 = vld [vmem:[%s62_s0] sm:$0x3]  ;;  %s34_s0 = smov 127  }
   0x2   :  { %6 = vst [vmem:[#allocation0] sm:$0x3] %v5_v0 }
   0x9   :  { %v10_v1 = vld [vmem:[#allocation0] sm:$0x3]  }
   0xa   :  { %v22_v2 = vld [vmem:[#allocation0] sm:$0x3]   ;;  %11 = vrot.lane.b32.xlu0 %v10_v1, %s34_s0 }
   0xb   :  { %23 = vrot.lane.b32.xlu1 %v22_v2, %s35_s8  ;;  %v7_v3 = vld [vmem:[#allocation0] sm:$0x3]  }
   0xc   :  { %v16_v4 = vld [vmem:[#allocation0] sm:$0x3]   ;;  %9 = vst.msk [vmem:[%s63_s1] ss:$4 sm:$0x3] %vm8_vm0, %v7_v3  }
   0xe   :  { %17 = vrot.lane.b32.xlu0 %v16_v4, %s36_s11 }
  0x7c   :  { %v12_v5 = vpop.permute.xlu0 %11  }
  0x7d   :  { %v24_v6 = vpop.permute.xlu1 %23   ;;  %28 = vst.msk [vmem:[%s63_s1 + $0x1] ss:$4 sm:$0x3] %vm8_vm0, %v12_v5  }
  0x7e   :  { %30 = vst.msk [vmem:[%s63_s1 + $0x3] ss:$4 sm:$0x3] %vm8_vm0, %v24_v6  }
  0x80   :  { %v18_v7 = vpop.permute.xlu0 %17  }
  0x81   :  { %29 = vst.msk [vmem:[%s63_s1 + $0x2] ss:$4 sm:$0x3] %vm8_vm0, %v18_v7  }

// kernel: tile.18
= control target key start
LH: loop header
LB: loop body
LE: loop exit
PB: predicated region body
PF: predicated region fallthrough
CT: control target
= control target key end

     0   :  { %2 = vsyncpa [#allocation1], 0  ;;  %s42_s6 = smov [#allocation0]   ;;  %s59_s0 = inlined_call_operand.hbm [shape: f32[4], index: 0, kind: input, shape index: {}]   ;;  %s60_s1 = inlined_call_operand.vmem [shape: f32[2,4], index: 1, kind: output, shape index: {}]  }
   0x1   :  { %s9_s7 = sshll.u32 %s42_s6, 4  ;;  %s10_s7 = int_to_ptr.vmem [resolvable:$true] %s9_s7 }
   0x2   :  { %s28_s8 = scalar_lea.vmem %s10_s7, 16  ;;  %s32_s9 = scalar_lea.vmem %s10_s7, 32 }
   0x3   :  { %p29_p0 = scmp.ne.s32.totalorder %s10_s7, %s28_s8  ;;  %p33_p1 = scmp.lt.s32.totalorder %s10_s7, %s10_s7 }
   0x4   :  { %p34_p2 = scmp.lt.s32.totalorder %s32_s9, %s28_s8 }
   0x6   :  { %p35_p3 = por %p34_p2, %p33_p1 }
   0x8   :  { %p36_p4 = pnand %p35_p3, %p29_p0 }
   0xa   :  { %39 = shalt.err (!%p36_p4)
}
   0xb   :  { %12 = dma.hbm_to_vmem [thread:$0]  %s59_s0, 16, %s10_s7, [#allocation1]  }
   0xc   :  { %40 = dma.done.wait [#allocation1], 16  }
   0xd   :  { %41 = vsyncadd [#allocation1], 4294967280  ;;  %v16_v0 = vld [vmem:[#allocation0] ss:$0 sm:$0xff] }
   0xe   :  { %17 = vst [vmem:[%s60_s1] sm:$0x3] %v16_v0 }
   0xf   :  { %18 = vsyncpa [#allocation1], 1 }

// kernel: _lambda_.1
= control target key start
LH: loop header
LB: loop body
LE: loop exit
PB: predicated region body
PF: predicated region fallthrough
CT: control target
= control target key end

     0   :  { %vm22_vm0 = vcmask 130048   ;;  %s271_s0 = inlined_call_operand.vmem [shape: f32[8,16], index: 0, kind: input, shape index: {}]   ;;  %s272_s1 = inlined_call_operand.vmem [shape: f32[8,1], index: 1, kind: input, shape index: {}]   ;;  %s273_s2 = inlined_call_operand.vmem [shape: f32[8,1], index: 2, kind: input, shape index: {}]   ;;  %s274_s3 = inlined_call_operand.vmem [shape: f32[16,16], index: 3, kind: input, shape index: {}]   ;;  %s275_s4 = inlined_call_operand.vmem [shape: f32[1,16], index: 4, kind: input, shape index: {}]   ;;  %s276_s5 = inlined_call_operand.hbm [shape: f32[8,16], index: 5, kind: output, shape index: {}]  }
   0x1   :  { %v21_v0 = vld [vmem:[%s271_s0] sm:$0xff] }
   0x2   :  { %10 = vsyncpa [#allocation3], 0  ;;  %v23_v1 = vsel %vm22_vm0, %v21_v0, 0.0  ;;  %v212_v7 = vmov 0   ;;  %v42_v8 = vld [vmem:[%s272_s1] sm:$0xff]  ;;  %v59_v18 = vld [vmem:[%s274_s3 + $0x8] sm:$0xff] }
   0x3   :  { %24 = vadd.xlane.f32.xlu0 %v23_v1  ;;  %182 = vset.pattern.permute.xlu1 %v212_v7  ;;  %v141_v9 = vadd.f32 1e-10, %v42_v8  ;;  %v213_v20 = vmov 0.0   ;;  %v58_v22 = vld [vmem:[%s274_s3] sm:$0xff]  ;;  %vm214_vm3 = vmmov 0  }
   0x4   :  { %183 = vset.pattern.permute.xlu0 %v212_v7  ;;  %171 = vmatprep.subr.mxu0 %v213_v20  ;;  %v43_v23 = vld [vmem:[%s273_s2] sm:$0xff]  ;;  %s215_s2 = smov [#allocation2]  }
   0x5   :  { %172 = vmatpush3.msra.mxu0 %v59_v18  ;;  %175 = vmatprep.mubr.msk.f32.mxu0 %vm214_vm3, %v213_v20  ;;  %v166_v29 = vld [vmem:[%s275_s4] ss:$0 sm:$0xff]  ;;  %s158_s3 = sshll.u32 %s215_s2, 4  ;;  %s159_s3 = int_to_ptr.vmem [resolvable:$true] %s158_s3 }
   0x6   :  { %173 = vmatprep.subr.mxu0 %v213_v20  ;;  %s190_s28 = scalar_lea.vmem %s159_s3, 128  ;;  %p195_p1 = scmp.lt.s32.totalorder %s159_s3, %s159_s3 }
   0x7   :  { %174 = vmatpush3.msra.mxu0 %v58_v22  ;;  %p191_p0 = scmp.ne.s32.totalorder %s159_s3, %s190_s28  ;;  %p196_p2 = scmp.lt.s32.totalorder %s190_s28, %s190_s28 }
   0x9   :  { %p197_p3 = por %p196_p2, %p195_p1 }
   0xb   :  { %p198_p4 = pnand %p197_p3, %p191_p0 }
  0x8c   :  { %v25_v2 = vpop.xlane.xlu0 %24 }
  0x8d   :  { %v27_v3 = vmul.f32 0.0625, %v25_v2 }
  0x8f   :  { %v28_v4 = vsub.f32 %v21_v0, %v27_v3 }
  0x91   :  { %v29_v5 = vmul.f32 %v28_v4, %v28_v4 }
  0x93   :  { %v30_v6 = vsel %vm22_vm0, %v29_v5, 0.0 }
  0x94   :  { %31 = vadd.xlane.f32.xlu0 %v30_v6 }
  0xaa   :  { %144 = vperm.xlu0 %183, %v141_v9  }
 0x11d   :  { %v32_v10 = vpop.xlane.xlu0 %31 }
 0x11e   :  { %v33_v11 = vmul.f32 0.0625, %v32_v10 }
 0x120   :  { %v34_v12 = vadd.f32 1e-05, %v33_v11 }
 0x122   :  { %184 = vrsqrt.f32 %v34_v12  ;;  %vm37_vm1 = vcmp.eq.f32.partialorder %v34_v12, inf  ;;  %v40_v15 = vand.u32 2147483648, %v34_v12  ;;  %vm39_vm2 = vcmp.eq.f32.partialorder %v34_v12, 0.0 }
 0x125   :  { %v145_v28 = vpop.permute.xlu0 %144 }
 0x12f   :  { %v185_v13 = vpop.eup %184 }
 0x130   :  { %v36_v14 = vmul.f32 %v185_v13, %v34_v12 }
 0x132   :  { %v38_v16 = vsel %vm37_vm1, %v34_v12, %v36_v14 }
 0x133   :  { %v41_v17 = vsel %vm39_vm2, %v40_v15, %v38_v16 }
 0x134   :  { %186 = vrcp.f32 %v41_v17 }
 0x135   :  { %188 = vrcp.f32 %v145_v28 }
 0x141   :  { %v187_v19 = vpop.eup %186 }
 0x142   :  { %v45_v21 = vmul.f32 %v187_v19, %v42_v8  ;;  %v189_v32 = vpop.eup %188 }
 0x144   :  { %48 = vperm.xlu1 %182, %v45_v21  }
 0x148   :  { %54 = vperm.xlu1 %182, %v43_v23  }
 0x1bf   :  { %v49_v24 = vpop.permute.xlu1 %48 }
 0x1c0   :  { %v51_v25 = vmul.f32 %v49_v24, %v28_v4 }
 0x1c3   :  { %v55_v26 = vpop.permute.xlu1 %54 }
 0x1c4   :  { %v57_v27 = vadd.f32 %v55_v26, %v51_v25 }
 0x1c6   :  { %176 = vmatmul.mubr.msk.f32.vlgmr.msra.gmra.mxu0 %vm22_vm0, %v57_v27 }
 0x286   :  { %v136_v30 = vpop.f32.mrf.mxu0 }
 0x287   :  { %v137_v31 = vadd.f32 %v166_v29, %v136_v30 }
 0x288   :  { %v177_v33 = vpop.f32.mrf.mxu0 }
 0x289   :  { %v140_v34 = vsub.f32 %v137_v31, %v55_v26 }
 0x28b   :  { %v148_v35 = vmul.f32 %v189_v32, %v140_v34 }
 0x28d   :  { %v149_v36 = vmul.f32 %v148_v35, %v41_v17 }
 0x28f   :  { %v150_v37 = vadd.f32 %v149_v36, %v27_v3 }
 0x291   :  { %151 = vst.msk [vmem:[#allocation2] sm:$0xff] %vm22_vm0, %v150_v37 }
 0x292   :  { %201 = shalt.err (!%p198_p4)
}
 0x293   :  { %161 = dma.vmem_to_hbm [thread:$0]  %s159_s3, 128, %s276_s5, [#allocation3]  }
 0x294   :  { %210 = dma.done.wait [#allocation3], 128  }
 0x295   :  { %211 = vsyncadd [#allocation3], 4294967168 }
 0x296   :  { %165 = vsyncpa [#allocation3], 1 }

</bundles_post_ra>
